<compile_context>
chip_gen: v7x
topology: tpu7x:2x2x1
jax: 0.10.0
libtpu: 0.0.40
codegen_flags: <defaults>
</compile_context>

<pallas_src>
import math

import jax
import jax.numpy as jnp
from jax.experimental import pallas as pl
from jax.experimental.pallas import tpu as pltpu


def _gru_kernel(x_ref, wx_ref, bx_ref, wh_ref, bh_ref, wfc_ref, bfc_ref,
                out_ref, h_scratch, gx_scratch, hy_scratch):
    c = pl.program_id(1)                    # time-chunk index (recurrent axis)
    TT, BB, D = x_ref.shape
    H = h_scratch.shape[1]
    M = TT * BB

    # Zero-initialize the hidden state at the first time chunk of each batch
    # tile (time is the innermost grid axis).
    @pl.when(c == 0)
    def _():
        h_scratch[...] = jnp.zeros_like(h_scratch)

    # ---- batched input projection for the whole chunk (off the serial path).
    # (TT*BB, D) @ (D, 3H) in bf16 on the MXU, f32 accumulation + f32 bias.
    x_flat = x_ref[...].reshape(M, D).astype(jnp.bfloat16)
    gx_scratch[...] = (
        jnp.dot(x_flat, wx_ref[...], preferred_element_type=jnp.float32)
        + bx_ref[...])

    wh = wh_ref[...]                         # (H, 3H) bf16, loop-invariant
    bh = bh_ref[...]                         # (1, 3H) f32

    # ---- serial recurrence over the TT timesteps of this chunk.
    def step(t, h):
        r0 = t * BB                          # sublane-aligned (BB % 8 == 0)
        gx = gx_scratch[pl.ds(r0, BB), :]    # (BB, 3H) f32, precomputed

        gh = jnp.dot(h.astype(jnp.bfloat16), wh,
                     preferred_element_type=jnp.float32) + bh

        i_r, i_i, i_n = gx[:, :H], gx[:, H:2 * H], gx[:, 2 * H:]
        h_r, h_i, h_n = gh[:, :H], gh[:, H:2 * H], gh[:, 2 * H:]

        resetgate = jax.nn.sigmoid(i_r + h_r)            # f32 elementwise
        inputgate = jax.nn.sigmoid(i_i + h_i)
        newgate = jnp.tanh(i_n + resetgate * h_n)
        hy = newgate + inputgate * (h - newgate)

        hy_scratch[pl.ds(r0, BB), :] = hy
        return hy

    h_final = jax.lax.fori_loop(0, TT, step, h_scratch[...], unroll=True)
    h_scratch[...] = h_final

    # ---- batched fc projection for the whole chunk: (TT*BB, H) @ (H, H).
    out = (jnp.dot(hy_scratch[...].astype(jnp.bfloat16), wfc_ref[...],
                   preferred_element_type=jnp.float32) + bfc_ref[...])
    out_ref[...] = out.reshape(TT, BB, H).astype(out_ref.dtype)


def gru_model_forward(x, params, *, time_chunk=32):
    """x: (B, T, D) float32. Returns (B, T, H)."""
    B, T, D = x.shape
    wx, bx, wh, bh, wfc, bfc = params
    H = wfc.shape[0]

    # Pad batch to a sublane multiple (>= 8); split into <=128-row batch tiles
    # that form a leading "parallel" grid axis (megacore on v7x).
    B8 = max(8, ((B + 7) // 8) * 8)
    BB = B8 if B8 <= 128 else 128
    B_pad = ((B8 + BB - 1) // BB) * BB

    TT = min(time_chunk, T)
    T_pad = ((T + TT - 1) // TT) * TT

    # (T, B, D) layout so each timestep is a contiguous row block in-kernel.
    x_tbd = jnp.zeros((T_pad, B_pad, D), jnp.float32)
    x_tbd = x_tbd.at[:T, :B, :].set(jnp.transpose(x, (1, 0, 2)))

    # Pre-transpose weights for plain (M,K)@(K,N) matmuls; bf16 for the MXU.
    wx_t = wx.T.astype(jnp.bfloat16)          # (D, 3H)
    wh_t = wh.T.astype(jnp.bfloat16)          # (H, 3H)
    wfc_t = wfc.T.astype(jnp.bfloat16)        # (H, H)
    bx2 = bx.reshape(1, 3 * H).astype(jnp.float32)
    bh2 = bh.reshape(1, 3 * H).astype(jnp.float32)
    bfc2 = bfc.reshape(1, H).astype(jnp.float32)

    grid = (B_pad // BB, T_pad // TT)

    out_tbh = pl.pallas_call(
        _gru_kernel,
        out_shape=jax.ShapeDtypeStruct((T_pad, B_pad, H), jnp.float32),
        grid_spec=pltpu.PrefetchScalarGridSpec(
            num_scalar_prefetch=0,
            grid=grid,
            in_specs=[
                pl.BlockSpec((TT, BB, D), lambda b, c: (c, b, 0)),   # x chunk
                pl.BlockSpec((D, 3 * H), lambda b, c: (0, 0)),       # W_x2h^T
                pl.BlockSpec((1, 3 * H), lambda b, c: (0, 0)),       # b_x2h
                pl.BlockSpec((H, 3 * H), lambda b, c: (0, 0)),       # W_h2h^T
                pl.BlockSpec((1, 3 * H), lambda b, c: (0, 0)),       # b_h2h
                pl.BlockSpec((H, H), lambda b, c: (0, 0)),           # W_fc^T
                pl.BlockSpec((1, H), lambda b, c: (0, 0)),           # b_fc
            ],
            out_specs=pl.BlockSpec((TT, BB, H), lambda b, c: (c, b, 0)),
            scratch_shapes=[
                pltpu.VMEM((BB, H), jnp.float32),            # hidden carry
                pltpu.VMEM((TT * BB, 3 * H), jnp.float32),   # gate_x chunk
                pltpu.VMEM((TT * BB, H), jnp.float32),       # hy chunk
            ],
        ),
        compiler_params=pltpu.CompilerParams(
            dimension_semantics=("parallel", "arbitrary")),  # batch | time
    )(x_tbd, wx_t, bx2, wh_t, bh2, wfc_t, bfc2)

    # Drop batch/time padding and return (B, T, H).
    return jnp.transpose(out_tbh[:T, :B, :], (1, 0, 2))


def init_params(key, input_dim, hidden_dim):
    """Parameter init mirroring GRUCell.reset_parameters and nn.Linear."""
    std = 1.0 / math.sqrt(hidden_dim)
    ks = jax.random.split(key, 6)
    wx = jax.random.uniform(ks[0], (3 * hidden_dim, input_dim),
                            jnp.float32, -std, std)
    bx = jax.random.uniform(ks[1], (3 * hidden_dim,), jnp.float32, -std, std)
    wh = jax.random.uniform(ks[2], (3 * hidden_dim, hidden_dim),
                            jnp.float32, -std, std)
    bh = jax.random.uniform(ks[3], (3 * hidden_dim,), jnp.float32, -std, std)
    wfc = jax.random.uniform(ks[4], (hidden_dim, hidden_dim),
                             jnp.float32, -std, std)
    bfc = jax.random.uniform(ks[5], (hidden_dim,), jnp.float32, -std, std)
    return (wx, bx, wh, bh, wfc, bfc)


def reference_forward(x, params):
    """Pure-JAX (f32) reference of GRUModel.forward."""
    wx, bx, wh, bh, wfc, bfc = params
    B, T, D = x.shape
    H = wfc.shape[0]
    h = jnp.zeros((B, H), jnp.float32)
    outs = []
    for t in range(T):
        gx = x[:, t, :] @ wx.T + bx
        gh = h @ wh.T + bh
        i_r, i_i, i_n = gx[:, :H], gx[:, H:2 * H], gx[:, 2 * H:]
        h_r, h_i, h_n = gh[:, :H], gh[:, H:2 * H], gh[:, 2 * H:]
        r = jax.nn.sigmoid(i_r + h_r)
        z = jax.nn.sigmoid(i_i + h_i)
        n = jnp.tanh(i_n + r * h_n)
        h = n + z * (h - n)
        outs.append(h[:, None, :])
    out = jnp.concatenate(outs, axis=1)
    return out @ wfc.T + bfc


if __name__ == "__main__":
    B, T, D, H = 2, 8, 4, 32
    key = jax.random.PRNGKey(0)
    k_x, k_p = jax.random.split(key)
    x = jax.random.normal(k_x, (B, T, D), jnp.float32)
    params = init_params(k_p, D, H)

    out = gru_model_forward(x, params)
    out = jax.block_until_ready(out)

    ref = reference_forward(x, params)
    assert out.shape == (B, T, H)
    # bf16 MXU inputs (f32 accumulation) -> compare against the f32 reference
    # with a correspondingly looser tolerance.
    max_err = float(jnp.max(jnp.abs(out - ref)))
    assert jnp.allclose(out, ref, atol=5e-2, rtol=5e-2), max_err
    print("KERNEL_OK")
</pallas_src>

<mosaic_0001>
module attributes {stable_mosaic.version = 11 : i64} {
  func.func @_gru_kernel(%arg0: i32, %arg1: i32, %arg2: memref<8x8x4xf32, #tpu.memory_space<vmem>>, %arg3: memref<4x96xbf16, #tpu.memory_space<vmem>>, %arg4: memref<1x96xf32, #tpu.memory_space<vmem>>, %arg5: memref<32x96xbf16, #tpu.memory_space<vmem>>, %arg6: memref<1x96xf32, #tpu.memory_space<vmem>>, %arg7: memref<32x32xbf16, #tpu.memory_space<vmem>>, %arg8: memref<1x32xf32, #tpu.memory_space<vmem>>, %arg9: memref<8x8x32xf32, #tpu.memory_space<vmem>>, %arg10: memref<8x32xf32, #tpu.memory_space<vmem>>, %arg11: memref<64x96xf32, #tpu.memory_space<vmem>>, %arg12: memref<64x32xf32, #tpu.memory_space<vmem>>) attributes {dimension_semantics = [#tpu.dimension_semantics<parallel>, #tpu.dimension_semantics<arbitrary>], iteration_bounds = array<i64: 1, 1>, scalar_prefetch = 0 : i64, scratch_operands = 3 : i64, tpu.core_type = #tpu.core_type<tc>, window_params = [{transform_indices = @transform_0, window_bounds = array<i64: 8, 8, 4>}, {pipeline_mode = #tpu.pipeline_mode<synchronous>, transform_indices = @transform_1, window_bounds = array<i64: 4, 96>}, {pipeline_mode = #tpu.pipeline_mode<synchronous>, transform_indices = @transform_2, window_bounds = array<i64: 1, 96>}, {pipeline_mode = #tpu.pipeline_mode<synchronous>, transform_indices = @transform_3, window_bounds = array<i64: 32, 96>}, {pipeline_mode = #tpu.pipeline_mode<synchronous>, transform_indices = @transform_4, window_bounds = array<i64: 1, 96>}, {pipeline_mode = #tpu.pipeline_mode<synchronous>, transform_indices = @transform_5, window_bounds = array<i64: 32, 32>}, {pipeline_mode = #tpu.pipeline_mode<synchronous>, transform_indices = @transform_6, window_bounds = array<i64: 1, 32>}, {transform_indices = @transform_7, window_bounds = array<i64: 8, 8, 32>}]} {
    %c0_i32 = arith.constant 0 : i32
    %0 = arith.cmpi eq, %arg1, %c0_i32 : i32
    %1 = arith.extui %0 : i1 to i32
    %c0_i32_0 = arith.constant 0 : i32
    %2 = arith.cmpi ne, %1, %c0_i32_0 : i32
    scf.if %2 {
      %cst_76 = arith.constant 0.000000e+00 : f32
      %289 = vector.broadcast %cst_76 : f32 to vector<8x32xf32>
      %c0_77 = arith.constant 0 : index
      %c0_78 = arith.constant 0 : index
      %290 = vector.load %arg10[%c0_77, %c0_78] : memref<8x32xf32, #tpu.memory_space<vmem>>, vector<8x32xf32>
      tpu.vector_store %arg10[%c0_77, %c0_78], %289 {strides = array<i32>} : memref<8x32xf32, #tpu.memory_space<vmem>>, vector<8x32xf32>,
    } else {
    }
    %c0 = arith.constant 0 : index
    %c0_1 = arith.constant 0 : index
    %c0_2 = arith.constant 0 : index
    %3 = vector.load %arg2[%c0, %c0_1, %c0_2] : memref<8x8x4xf32, #tpu.memory_space<vmem>>, vector<8x8x4xf32>
    %4 = vector.shape_cast %3 : vector<8x8x4xf32> to vector<64x4xf32>
    %5 = arith.truncf %4 : vector<64x4xf32> to vector<64x4xbf16>
    %c0_3 = arith.constant 0 : index
    %c0_4 = arith.constant 0 : index
    %6 = vector.load %arg3[%c0_3, %c0_4] : memref<4x96xbf16, #tpu.memory_space<vmem>>, vector<4x96xbf16>
    %cst = arith.constant dense<0.000000e+00> : vector<64x96xf32>
    %7 = tpu.matmul %5, %6, %cst {dimension_numbers = #tpu.dot_dimension_numbers<[1], [0], [0], [1], [0, 0, 1, 1], [], []>} : vector<64x4xbf16>, vector<4x96xbf16>, vector<64x96xf32> -> vector<64x96xf32>
    %c0_5 = arith.constant 0 : index
    %c0_6 = arith.constant 0 : index
    %8 = vector.load %arg4[%c0_5, %c0_6] : memref<1x96xf32, #tpu.memory_space<vmem>>, vector<1x96xf32>
    %9 = vector.broadcast %8 : vector<1x96xf32> to vector<64x96xf32>
    %10 = arith.addf %7, %9 : vector<64x96xf32>
    %c0_7 = arith.constant 0 : index
    %c0_8 = arith.constant 0 : index
    %11 = vector.load %arg11[%c0_7, %c0_8] : memref<64x96xf32, #tpu.memory_space<vmem>>, vector<64x96xf32>
    tpu.vector_store %arg11[%c0_7, %c0_8], %10 {strides = array<i32>} : memref<64x96xf32, #tpu.memory_space<vmem>>, vector<64x96xf32>,
    %c0_9 = arith.constant 0 : index
    %c0_10 = arith.constant 0 : index
    %12 = vector.load %arg5[%c0_9, %c0_10] : memref<32x96xbf16, #tpu.memory_space<vmem>>, vector<32x96xbf16>
    %c0_11 = arith.constant 0 : index
    %c0_12 = arith.constant 0 : index
    %13 = vector.load %arg6[%c0_11, %c0_12] : memref<1x96xf32, #tpu.memory_space<vmem>>, vector<1x96xf32>
    %c0_13 = arith.constant 0 : index
    %c0_14 = arith.constant 0 : index
    %14 = vector.load %arg10[%c0_13, %c0_14] : memref<8x32xf32, #tpu.memory_space<vmem>>, vector<8x32xf32>
    %c0_i32_15 = arith.constant 0 : i32
    %c8_i32 = arith.constant 8 : i32
    %15 = arith.muli %c0_i32_15, %c8_i32 : i32
    %16 = arith.index_cast %15 : i32 to index
    %c0_16 = arith.constant 0 : index
    %17 = vector.load %arg11[%16, %c0_16] : memref<64x96xf32, #tpu.memory_space<vmem>>, vector<8x96xf32>
    %18 = arith.truncf %14 : vector<8x32xf32> to vector<8x32xbf16>
    %cst_17 = arith.constant dense<0.000000e+00> : vector<8x96xf32>
    %19 = tpu.matmul %18, %12, %cst_17 {dimension_numbers = #tpu.dot_dimension_numbers<[1], [0], [0], [1], [0, 0, 1, 1], [], []>} : vector<8x32xbf16>, vector<32x96xbf16>, vector<8x96xf32> -> vector<8x96xf32>
    %20 = vector.broadcast %13 : vector<1x96xf32> to vector<8x96xf32>
    %21 = arith.addf %19, %20 : vector<8x96xf32>
    %22 = vector.extract_strided_slice %17 {offsets = [0, 0], sizes = [8, 32], strides = [1, 1]} : vector<8x96xf32> to vector<8x32xf32>
    %23 = vector.extract_strided_slice %17 {offsets = [0, 32], sizes = [8, 32], strides = [1, 1]} : vector<8x96xf32> to vector<8x32xf32>
    %24 = vector.extract_strided_slice %17 {offsets = [0, 64], sizes = [8, 32], strides = [1, 1]} : vector<8x96xf32> to vector<8x32xf32>
    %25 = vector.extract_strided_slice %21 {offsets = [0, 0], sizes = [8, 32], strides = [1, 1]} : vector<8x96xf32> to vector<8x32xf32>
    %26 = vector.extract_strided_slice %21 {offsets = [0, 32], sizes = [8, 32], strides = [1, 1]} : vector<8x96xf32> to vector<8x32xf32>
    %27 = vector.extract_strided_slice %21 {offsets = [0, 64], sizes = [8, 32], strides = [1, 1]} : vector<8x96xf32> to vector<8x32xf32>
    %28 = arith.addf %22, %25 : vector<8x32xf32>
    %29 = arith.negf %28 : vector<8x32xf32>
    %30 = math.exp %29 : vector<8x32xf32>
    %cst_18 = arith.constant 1.000000e+00 : f32
    %31 = vector.broadcast %cst_18 : f32 to vector<8x32xf32>
    %32 = arith.addf %31, %30 : vector<8x32xf32>
    %33 = arith.divf %31, %32 : vector<8x32xf32>
    %34 = arith.addf %23, %26 : vector<8x32xf32>
    %35 = arith.negf %34 : vector<8x32xf32>
    %36 = math.exp %35 : vector<8x32xf32>
    %cst_19 = arith.constant 1.000000e+00 : f32
    %37 = vector.broadcast %cst_19 : f32 to vector<8x32xf32>
    %38 = arith.addf %37, %36 : vector<8x32xf32>
    %39 = arith.divf %37, %38 : vector<8x32xf32>
    %40 = arith.mulf %33, %27 : vector<8x32xf32>
    %41 = arith.addf %24, %40 : vector<8x32xf32>
    %42 = math.tanh %41 : vector<8x32xf32>
    %43 = arith.subf %14, %42 : vector<8x32xf32>
    %44 = arith.mulf %39, %43 : vector<8x32xf32>
    %45 = arith.addf %42, %44 : vector<8x32xf32>
    %46 = arith.index_cast %15 : i32 to index
    %c0_20 = arith.constant 0 : index
    %47 = vector.load %arg12[%46, %c0_20] : memref<64x32xf32, #tpu.memory_space<vmem>>, vector<8x32xf32>
    tpu.vector_store %arg12[%46, %c0_20], %45 {strides = array<i32>} : memref<64x32xf32, #tpu.memory_space<vmem>>, vector<8x32xf32>,
    %c1_i32 = arith.constant 1 : i32
    %c8_i32_21 = arith.constant 8 : i32
    %48 = arith.muli %c1_i32, %c8_i32_21 : i32
    %49 = arith.index_cast %48 : i32 to index
    %c0_22 = arith.constant 0 : index
    %50 = vector.load %arg11[%49, %c0_22] : memref<64x96xf32, #tpu.memory_space<vmem>>, vector<8x96xf32>
    %51 = arith.truncf %45 : vector<8x32xf32> to vector<8x32xbf16>
    %cst_23 = arith.constant dense<0.000000e+00> : vector<8x96xf32>
    %52 = tpu.matmul %51, %12, %cst_23 {dimension_numbers = #tpu.dot_dimension_numbers<[1], [0], [0], [1], [0, 0, 1, 1], [], []>} : vector<8x32xbf16>, vector<32x96xbf16>, vector<8x96xf32> -> vector<8x96xf32>
    %53 = vector.broadcast %13 : vector<1x96xf32> to vector<8x96xf32>
    %54 = arith.addf %52, %53 : vector<8x96xf32>
    %55 = vector.extract_strided_slice %50 {offsets = [0, 0], sizes = [8, 32], strides = [1, 1]} : vector<8x96xf32> to vector<8x32xf32>
    %56 = vector.extract_strided_slice %50 {offsets = [0, 32], sizes = [8, 32], strides = [1, 1]} : vector<8x96xf32> to vector<8x32xf32>
    %57 = vector.extract_strided_slice %50 {offsets = [0, 64], sizes = [8, 32], strides = [1, 1]} : vector<8x96xf32> to vector<8x32xf32>
    %58 = vector.extract_strided_slice %54 {offsets = [0, 0], sizes = [8, 32], strides = [1, 1]} : vector<8x96xf32> to vector<8x32xf32>
    %59 = vector.extract_strided_slice %54 {offsets = [0, 32], sizes = [8, 32], strides = [1, 1]} : vector<8x96xf32> to vector<8x32xf32>
    %60 = vector.extract_strided_slice %54 {offsets = [0, 64], sizes = [8, 32], strides = [1, 1]} : vector<8x96xf32> to vector<8x32xf32>
    %61 = arith.addf %55, %58 : vector<8x32xf32>
    %62 = arith.negf %61 : vector<8x32xf32>
    %63 = math.exp %62 : vector<8x32xf32>
    %cst_24 = arith.constant 1.000000e+00 : f32
    %64 = vector.broadcast %cst_24 : f32 to vector<8x32xf32>
    %65 = arith.addf %64, %63 : vector<8x32xf32>
    %66 = arith.divf %64, %65 : vector<8x32xf32>
    %67 = arith.addf %56, %59 : vector<8x32xf32>
    %68 = arith.negf %67 : vector<8x32xf32>
    %69 = math.exp %68 : vector<8x32xf32>
    %cst_25 = arith.constant 1.000000e+00 : f32
    %70 = vector.broadcast %cst_25 : f32 to vector<8x32xf32>
    %71 = arith.addf %70, %69 : vector<8x32xf32>
    %72 = arith.divf %70, %71 : vector<8x32xf32>
    %73 = arith.mulf %66, %60 : vector<8x32xf32>
    %74 = arith.addf %57, %73 : vector<8x32xf32>
    %75 = math.tanh %74 : vector<8x32xf32>
    %76 = arith.subf %45, %75 : vector<8x32xf32>
    %77 = arith.mulf %72, %76 : vector<8x32xf32>
    %78 = arith.addf %75, %77 : vector<8x32xf32>
    %79 = arith.index_cast %48 : i32 to index
    %c0_26 = arith.constant 0 : index
    %80 = vector.load %arg12[%79, %c0_26] : memref<64x32xf32, #tpu.memory_space<vmem>>, vector<8x32xf32>
    tpu.vector_store %arg12[%79, %c0_26], %78 {strides = array<i32>} : memref<64x32xf32, #tpu.memory_space<vmem>>, vector<8x32xf32>,
    %c2_i32 = arith.constant 2 : i32
    %c8_i32_27 = arith.constant 8 : i32
    %81 = arith.muli %c2_i32, %c8_i32_27 : i32
    %82 = arith.index_cast %81 : i32 to index
    %c0_28 = arith.constant 0 : index
    %83 = vector.load %arg11[%82, %c0_28] : memref<64x96xf32, #tpu.memory_space<vmem>>, vector<8x96xf32>
    %84 = arith.truncf %78 : vector<8x32xf32> to vector<8x32xbf16>
    %cst_29 = arith.constant dense<0.000000e+00> : vector<8x96xf32>
    %85 = tpu.matmul %84, %12, %cst_29 {dimension_numbers = #tpu.dot_dimension_numbers<[1], [0], [0], [1], [0, 0, 1, 1], [], []>} : vector<8x32xbf16>, vector<32x96xbf16>, vector<8x96xf32> -> vector<8x96xf32>
    %86 = vector.broadcast %13 : vector<1x96xf32> to vector<8x96xf32>
    %87 = arith.addf %85, %86 : vector<8x96xf32>
    %88 = vector.extract_strided_slice %83 {offsets = [0, 0], sizes = [8, 32], strides = [1, 1]} : vector<8x96xf32> to vector<8x32xf32>
    %89 = vector.extract_strided_slice %83 {offsets = [0, 32], sizes = [8, 32], strides = [1, 1]} : vector<8x96xf32> to vector<8x32xf32>
    %90 = vector.extract_strided_slice %83 {offsets = [0, 64], sizes = [8, 32], strides = [1, 1]} : vector<8x96xf32> to vector<8x32xf32>
    %91 = vector.extract_strided_slice %87 {offsets = [0, 0], sizes = [8, 32], strides = [1, 1]} : vector<8x96xf32> to vector<8x32xf32>
    %92 = vector.extract_strided_slice %87 {offsets = [0, 32], sizes = [8, 32], strides = [1, 1]} : vector<8x96xf32> to vector<8x32xf32>
    %93 = vector.extract_strided_slice %87 {offsets = [0, 64], sizes = [8, 32], strides = [1, 1]} : vector<8x96xf32> to vector<8x32xf32>
    %94 = arith.addf %88, %91 : vector<8x32xf32>
    %95 = arith.negf %94 : vector<8x32xf32>
    %96 = math.exp %95 : vector<8x32xf32>
    %cst_30 = arith.constant 1.000000e+00 : f32
    %97 = vector.broadcast %cst_30 : f32 to vector<8x32xf32>
    %98 = arith.addf %97, %96 : vector<8x32xf32>
    %99 = arith.divf %97, %98 : vector<8x32xf32>
    %100 = arith.addf %89, %92 : vector<8x32xf32>
    %101 = arith.negf %100 : vector<8x32xf32>
    %102 = math.exp %101 : vector<8x32xf32>
    %cst_31 = arith.constant 1.000000e+00 : f32
    %103 = vector.broadcast %cst_31 : f32 to vector<8x32xf32>
    %104 = arith.addf %103, %102 : vector<8x32xf32>
    %105 = arith.divf %103, %104 : vector<8x32xf32>
    %106 = arith.mulf %99, %93 : vector<8x32xf32>
    %107 = arith.addf %90, %106 : vector<8x32xf32>
    %108 = math.tanh %107 : vector<8x32xf32>
    %109 = arith.subf %78, %108 : vector<8x32xf32>
    %110 = arith.mulf %105, %109 : vector<8x32xf32>
    %111 = arith.addf %108, %110 : vector<8x32xf32>
    %112 = arith.index_cast %81 : i32 to index
    %c0_32 = arith.constant 0 : index
    %113 = vector.load %arg12[%112, %c0_32] : memref<64x32xf32, #tpu.memory_space<vmem>>, vector<8x32xf32>
    tpu.vector_store %arg12[%112, %c0_32], %111 {strides = array<i32>} : memref<64x32xf32, #tpu.memory_space<vmem>>, vector<8x32xf32>,
    %c3_i32 = arith.constant 3 : i32
    %c8_i32_33 = arith.constant 8 : i32
    %114 = arith.muli %c3_i32, %c8_i32_33 : i32
    %115 = arith.index_cast %114 : i32 to index
    %c0_34 = arith.constant 0 : index
    %116 = vector.load %arg11[%115, %c0_34] : memref<64x96xf32, #tpu.memory_space<vmem>>, vector<8x96xf32>
    %117 = arith.truncf %111 : vector<8x32xf32> to vector<8x32xbf16>
    %cst_35 = arith.constant dense<0.000000e+00> : vector<8x96xf32>
    %118 = tpu.matmul %117, %12, %cst_35 {dimension_numbers = #tpu.dot_dimension_numbers<[1], [0], [0], [1], [0, 0, 1, 1], [], []>} : vector<8x32xbf16>, vector<32x96xbf16>, vector<8x96xf32> -> vector<8x96xf32>
    %119 = vector.broadcast %13 : vector<1x96xf32> to vector<8x96xf32>
    %120 = arith.addf %118, %119 : vector<8x96xf32>
    %121 = vector.extract_strided_slice %116 {offsets = [0, 0], sizes = [8, 32], strides = [1, 1]} : vector<8x96xf32> to vector<8x32xf32>
    %122 = vector.extract_strided_slice %116 {offsets = [0, 32], sizes = [8, 32], strides = [1, 1]} : vector<8x96xf32> to vector<8x32xf32>
    %123 = vector.extract_strided_slice %116 {offsets = [0, 64], sizes = [8, 32], strides = [1, 1]} : vector<8x96xf32> to vector<8x32xf32>
    %124 = vector.extract_strided_slice %120 {offsets = [0, 0], sizes = [8, 32], strides = [1, 1]} : vector<8x96xf32> to vector<8x32xf32>
    %125 = vector.extract_strided_slice %120 {offsets = [0, 32], sizes = [8, 32], strides = [1, 1]} : vector<8x96xf32> to vector<8x32xf32>
    %126 = vector.extract_strided_slice %120 {offsets = [0, 64], sizes = [8, 32], strides = [1, 1]} : vector<8x96xf32> to vector<8x32xf32>
    %127 = arith.addf %121, %124 : vector<8x32xf32>
    %128 = arith.negf %127 : vector<8x32xf32>
    %129 = math.exp %128 : vector<8x32xf32>
    %cst_36 = arith.constant 1.000000e+00 : f32
    %130 = vector.broadcast %cst_36 : f32 to vector<8x32xf32>
    %131 = arith.addf %130, %129 : vector<8x32xf32>
    %132 = arith.divf %130, %131 : vector<8x32xf32>
    %133 = arith.addf %122, %125 : vector<8x32xf32>
    %134 = arith.negf %133 : vector<8x32xf32>
    %135 = math.exp %134 : vector<8x32xf32>
    %cst_37 = arith.constant 1.000000e+00 : f32
    %136 = vector.broadcast %cst_37 : f32 to vector<8x32xf32>
    %137 = arith.addf %136, %135 : vector<8x32xf32>
    %138 = arith.divf %136, %137 : vector<8x32xf32>
    %139 = arith.mulf %132, %126 : vector<8x32xf32>
    %140 = arith.addf %123, %139 : vector<8x32xf32>
    %141 = math.tanh %140 : vector<8x32xf32>
    %142 = arith.subf %111, %141 : vector<8x32xf32>
    %143 = arith.mulf %138, %142 : vector<8x32xf32>
    %144 = arith.addf %141, %143 : vector<8x32xf32>
    %145 = arith.index_cast %114 : i32 to index
    %c0_38 = arith.constant 0 : index
    %146 = vector.load %arg12[%145, %c0_38] : memref<64x32xf32, #tpu.memory_space<vmem>>, vector<8x32xf32>
    tpu.vector_store %arg12[%145, %c0_38], %144 {strides = array<i32>} : memref<64x32xf32, #tpu.memory_space<vmem>>, vector<8x32xf32>,
    %c4_i32 = arith.constant 4 : i32
    %c8_i32_39 = arith.constant 8 : i32
    %147 = arith.muli %c4_i32, %c8_i32_39 : i32
    %148 = arith.index_cast %147 : i32 to index
    %c0_40 = arith.constant 0 : index
    %149 = vector.load %arg11[%148, %c0_40] : memref<64x96xf32, #tpu.memory_space<vmem>>, vector<8x96xf32>
    %150 = arith.truncf %144 : vector<8x32xf32> to vector<8x32xbf16>
    %cst_41 = arith.constant dense<0.000000e+00> : vector<8x96xf32>
    %151 = tpu.matmul %150, %12, %cst_41 {dimension_numbers = #tpu.dot_dimension_numbers<[1], [0], [0], [1], [0, 0, 1, 1], [], []>} : vector<8x32xbf16>, vector<32x96xbf16>, vector<8x96xf32> -> vector<8x96xf32>
    %152 = vector.broadcast %13 : vector<1x96xf32> to vector<8x96xf32>
    %153 = arith.addf %151, %152 : vector<8x96xf32>
    %154 = vector.extract_strided_slice %149 {offsets = [0, 0], sizes = [8, 32], strides = [1, 1]} : vector<8x96xf32> to vector<8x32xf32>
    %155 = vector.extract_strided_slice %149 {offsets = [0, 32], sizes = [8, 32], strides = [1, 1]} : vector<8x96xf32> to vector<8x32xf32>
    %156 = vector.extract_strided_slice %149 {offsets = [0, 64], sizes = [8, 32], strides = [1, 1]} : vector<8x96xf32> to vector<8x32xf32>
    %157 = vector.extract_strided_slice %153 {offsets = [0, 0], sizes = [8, 32], strides = [1, 1]} : vector<8x96xf32> to vector<8x32xf32>
    %158 = vector.extract_strided_slice %153 {offsets = [0, 32], sizes = [8, 32], strides = [1, 1]} : vector<8x96xf32> to vector<8x32xf32>
    %159 = vector.extract_strided_slice %153 {offsets = [0, 64], sizes = [8, 32], strides = [1, 1]} : vector<8x96xf32> to vector<8x32xf32>
    %160 = arith.addf %154, %157 : vector<8x32xf32>
    %161 = arith.negf %160 : vector<8x32xf32>
    %162 = math.exp %161 : vector<8x32xf32>
    %cst_42 = arith.constant 1.000000e+00 : f32
    %163 = vector.broadcast %cst_42 : f32 to vector<8x32xf32>
    %164 = arith.addf %163, %162 : vector<8x32xf32>
    %165 = arith.divf %163, %164 : vector<8x32xf32>
    %166 = arith.addf %155, %158 : vector<8x32xf32>
    %167 = arith.negf %166 : vector<8x32xf32>
    %168 = math.exp %167 : vector<8x32xf32>
    %cst_43 = arith.constant 1.000000e+00 : f32
    %169 = vector.broadcast %cst_43 : f32 to vector<8x32xf32>
    %170 = arith.addf %169, %168 : vector<8x32xf32>
    %171 = arith.divf %169, %170 : vector<8x32xf32>
    %172 = arith.mulf %165, %159 : vector<8x32xf32>
    %173 = arith.addf %156, %172 : vector<8x32xf32>
    %174 = math.tanh %173 : vector<8x32xf32>
    %175 = arith.subf %144, %174 : vector<8x32xf32>
    %176 = arith.mulf %171, %175 : vector<8x32xf32>
    %177 = arith.addf %174, %176 : vector<8x32xf32>
    %178 = arith.index_cast %147 : i32 to index
    %c0_44 = arith.constant 0 : index
    %179 = vector.load %arg12[%178, %c0_44] : memref<64x32xf32, #tpu.memory_space<vmem>>, vector<8x32xf32>
    tpu.vector_store %arg12[%178, %c0_44], %177 {strides = array<i32>} : memref<64x32xf32, #tpu.memory_space<vmem>>, vector<8x32xf32>,
    %c5_i32 = arith.constant 5 : i32
    %c8_i32_45 = arith.constant 8 : i32
    %180 = arith.muli %c5_i32, %c8_i32_45 : i32
    %181 = arith.index_cast %180 : i32 to index
    %c0_46 = arith.constant 0 : index
    %182 = vector.load %arg11[%181, %c0_46] : memref<64x96xf32, #tpu.memory_space<vmem>>, vector<8x96xf32>
    %183 = arith.truncf %177 : vector<8x32xf32> to vector<8x32xbf16>
    %cst_47 = arith.constant dense<0.000000e+00> : vector<8x96xf32>
    %184 = tpu.matmul %183, %12, %cst_47 {dimension_numbers = #tpu.dot_dimension_numbers<[1], [0], [0], [1], [0, 0, 1, 1], [], []>} : vector<8x32xbf16>, vector<32x96xbf16>, vector<8x96xf32> -> vector<8x96xf32>
    %185 = vector.broadcast %13 : vector<1x96xf32> to vector<8x96xf32>
    %186 = arith.addf %184, %185 : vector<8x96xf32>
    %187 = vector.extract_strided_slice %182 {offsets = [0, 0], sizes = [8, 32], strides = [1, 1]} : vector<8x96xf32> to vector<8x32xf32>
    %188 = vector.extract_strided_slice %182 {offsets = [0, 32], sizes = [8, 32], strides = [1, 1]} : vector<8x96xf32> to vector<8x32xf32>
    %189 = vector.extract_strided_slice %182 {offsets = [0, 64], sizes = [8, 32], strides = [1, 1]} : vector<8x96xf32> to vector<8x32xf32>
    %190 = vector.extract_strided_slice %186 {offsets = [0, 0], sizes = [8, 32], strides = [1, 1]} : vector<8x96xf32> to vector<8x32xf32>
    %191 = vector.extract_strided_slice %186 {offsets = [0, 32], sizes = [8, 32], strides = [1, 1]} : vector<8x96xf32> to vector<8x32xf32>
    %192 = vector.extract_strided_slice %186 {offsets = [0, 64], sizes = [8, 32], strides = [1, 1]} : vector<8x96xf32> to vector<8x32xf32>
    %193 = arith.addf %187, %190 : vector<8x32xf32>
    %194 = arith.negf %193 : vector<8x32xf32>
    %195 = math.exp %194 : vector<8x32xf32>
    %cst_48 = arith.constant 1.000000e+00 : f32
    %196 = vector.broadcast %cst_48 : f32 to vector<8x32xf32>
    %197 = arith.addf %196, %195 : vector<8x32xf32>
    %198 = arith.divf %196, %197 : vector<8x32xf32>
    %199 = arith.addf %188, %191 : vector<8x32xf32>
    %200 = arith.negf %199 : vector<8x32xf32>
    %201 = math.exp %200 : vector<8x32xf32>
    %cst_49 = arith.constant 1.000000e+00 : f32
    %202 = vector.broadcast %cst_49 : f32 to vector<8x32xf32>
    %203 = arith.addf %202, %201 : vector<8x32xf32>
    %204 = arith.divf %202, %203 : vector<8x32xf32>
    %205 = arith.mulf %198, %192 : vector<8x32xf32>
    %206 = arith.addf %189, %205 : vector<8x32xf32>
    %207 = math.tanh %206 : vector<8x32xf32>
    %208 = arith.subf %177, %207 : vector<8x32xf32>
    %209 = arith.mulf %204, %208 : vector<8x32xf32>
    %210 = arith.addf %207, %209 : vector<8x32xf32>
    %211 = arith.index_cast %180 : i32 to index
    %c0_50 = arith.constant 0 : index
    %212 = vector.load %arg12[%211, %c0_50] : memref<64x32xf32, #tpu.memory_space<vmem>>, vector<8x32xf32>
    tpu.vector_store %arg12[%211, %c0_50], %210 {strides = array<i32>} : memref<64x32xf32, #tpu.memory_space<vmem>>, vector<8x32xf32>,
    %c6_i32 = arith.constant 6 : i32
    %c8_i32_51 = arith.constant 8 : i32
    %213 = arith.muli %c6_i32, %c8_i32_51 : i32
    %214 = arith.index_cast %213 : i32 to index
    %c0_52 = arith.constant 0 : index
    %215 = vector.load %arg11[%214, %c0_52] : memref<64x96xf32, #tpu.memory_space<vmem>>, vector<8x96xf32>
    %216 = arith.truncf %210 : vector<8x32xf32> to vector<8x32xbf16>
    %cst_53 = arith.constant dense<0.000000e+00> : vector<8x96xf32>
    %217 = tpu.matmul %216, %12, %cst_53 {dimension_numbers = #tpu.dot_dimension_numbers<[1], [0], [0], [1], [0, 0, 1, 1], [], []>} : vector<8x32xbf16>, vector<32x96xbf16>, vector<8x96xf32> -> vector<8x96xf32>
    %218 = vector.broadcast %13 : vector<1x96xf32> to vector<8x96xf32>
    %219 = arith.addf %217, %218 : vector<8x96xf32>
    %220 = vector.extract_strided_slice %215 {offsets = [0, 0], sizes = [8, 32], strides = [1, 1]} : vector<8x96xf32> to vector<8x32xf32>
    %221 = vector.extract_strided_slice %215 {offsets = [0, 32], sizes = [8, 32], strides = [1, 1]} : vector<8x96xf32> to vector<8x32xf32>
    %222 = vector.extract_strided_slice %215 {offsets = [0, 64], sizes = [8, 32], strides = [1, 1]} : vector<8x96xf32> to vector<8x32xf32>
    %223 = vector.extract_strided_slice %219 {offsets = [0, 0], sizes = [8, 32], strides = [1, 1]} : vector<8x96xf32> to vector<8x32xf32>
    %224 = vector.extract_strided_slice %219 {offsets = [0, 32], sizes = [8, 32], strides = [1, 1]} : vector<8x96xf32> to vector<8x32xf32>
    %225 = vector.extract_strided_slice %219 {offsets = [0, 64], sizes = [8, 32], strides = [1, 1]} : vector<8x96xf32> to vector<8x32xf32>
    %226 = arith.addf %220, %223 : vector<8x32xf32>
    %227 = arith.negf %226 : vector<8x32xf32>
    %228 = math.exp %227 : vector<8x32xf32>
    %cst_54 = arith.constant 1.000000e+00 : f32
    %229 = vector.broadcast %cst_54 : f32 to vector<8x32xf32>
    %230 = arith.addf %229, %228 : vector<8x32xf32>
    %231 = arith.divf %229, %230 : vector<8x32xf32>
    %232 = arith.addf %221, %224 : vector<8x32xf32>
    %233 = arith.negf %232 : vector<8x32xf32>
    %234 = math.exp %233 : vector<8x32xf32>
    %cst_55 = arith.constant 1.000000e+00 : f32
    %235 = vector.broadcast %cst_55 : f32 to vector<8x32xf32>
    %236 = arith.addf %235, %234 : vector<8x32xf32>
    %237 = arith.divf %235, %236 : vector<8x32xf32>
    %238 = arith.mulf %231, %225 : vector<8x32xf32>
    %239 = arith.addf %222, %238 : vector<8x32xf32>
    %240 = math.tanh %239 : vector<8x32xf32>
    %241 = arith.subf %210, %240 : vector<8x32xf32>
    %242 = arith.mulf %237, %241 : vector<8x32xf32>
    %243 = arith.addf %240, %242 : vector<8x32xf32>
    %244 = arith.index_cast %213 : i32 to index
    %c0_56 = arith.constant 0 : index
    %245 = vector.load %arg12[%244, %c0_56] : memref<64x32xf32, #tpu.memory_space<vmem>>, vector<8x32xf32>
    tpu.vector_store %arg12[%244, %c0_56], %243 {strides = array<i32>} : memref<64x32xf32, #tpu.memory_space<vmem>>, vector<8x32xf32>,
    %c7_i32 = arith.constant 7 : i32
    %c8_i32_57 = arith.constant 8 : i32
    %246 = arith.muli %c7_i32, %c8_i32_57 : i32
    %247 = arith.index_cast %246 : i32 to index
    %c0_58 = arith.constant 0 : index
    %248 = vector.load %arg11[%247, %c0_58] : memref<64x96xf32, #tpu.memory_space<vmem>>, vector<8x96xf32>
    %249 = arith.truncf %243 : vector<8x32xf32> to vector<8x32xbf16>
    %cst_59 = arith.constant dense<0.000000e+00> : vector<8x96xf32>
    %250 = tpu.matmul %249, %12, %cst_59 {dimension_numbers = #tpu.dot_dimension_numbers<[1], [0], [0], [1], [0, 0, 1, 1], [], []>} : vector<8x32xbf16>, vector<32x96xbf16>, vector<8x96xf32> -> vector<8x96xf32>
    %251 = vector.broadcast %13 : vector<1x96xf32> to vector<8x96xf32>
    %252 = arith.addf %250, %251 : vector<8x96xf32>
    %253 = vector.extract_strided_slice %248 {offsets = [0, 0], sizes = [8, 32], strides = [1, 1]} : vector<8x96xf32> to vector<8x32xf32>
    %254 = vector.extract_strided_slice %248 {offsets = [0, 32], sizes = [8, 32], strides = [1, 1]} : vector<8x96xf32> to vector<8x32xf32>
    %255 = vector.extract_strided_slice %248 {offsets = [0, 64], sizes = [8, 32], strides = [1, 1]} : vector<8x96xf32> to vector<8x32xf32>
    %256 = vector.extract_strided_slice %252 {offsets = [0, 0], sizes = [8, 32], strides = [1, 1]} : vector<8x96xf32> to vector<8x32xf32>
    %257 = vector.extract_strided_slice %252 {offsets = [0, 32], sizes = [8, 32], strides = [1, 1]} : vector<8x96xf32> to vector<8x32xf32>
    %258 = vector.extract_strided_slice %252 {offsets = [0, 64], sizes = [8, 32], strides = [1, 1]} : vector<8x96xf32> to vector<8x32xf32>
    %259 = arith.addf %253, %256 : vector<8x32xf32>
    %260 = arith.negf %259 : vector<8x32xf32>
    %261 = math.exp %260 : vector<8x32xf32>
    %cst_60 = arith.constant 1.000000e+00 : f32
    %262 = vector.broadcast %cst_60 : f32 to vector<8x32xf32>
    %263 = arith.addf %262, %261 : vector<8x32xf32>
    %264 = arith.divf %262, %263 : vector<8x32xf32>
    %265 = arith.addf %254, %257 : vector<8x32xf32>
    %266 = arith.negf %265 : vector<8x32xf32>
    %267 = math.exp %266 : vector<8x32xf32>
    %cst_61 = arith.constant 1.000000e+00 : f32
    %268 = vector.broadcast %cst_61 : f32 to vector<8x32xf32>
    %269 = arith.addf %268, %267 : vector<8x32xf32>
    %270 = arith.divf %268, %269 : vector<8x32xf32>
    %271 = arith.mulf %264, %258 : vector<8x32xf32>
    %272 = arith.addf %255, %271 : vector<8x32xf32>
    %273 = math.tanh %272 : vector<8x32xf32>
    %274 = arith.subf %243, %273 : vector<8x32xf32>
    %275 = arith.mulf %270, %274 : vector<8x32xf32>
    %276 = arith.addf %273, %275 : vector<8x32xf32>
    %277 = arith.index_cast %246 : i32 to index
    %c0_62 = arith.constant 0 : index
    %278 = vector.load %arg12[%277, %c0_62] : memref<64x32xf32, #tpu.memory_space<vmem>>, vector<8x32xf32>
    tpu.vector_store %arg12[%277, %c0_62], %276 {strides = array<i32>} : memref<64x32xf32, #tpu.memory_space<vmem>>, vector<8x32xf32>,
    %c8_i32_63 = arith.constant 8 : i32
    %c0_64 = arith.constant 0 : index
    %c0_65 = arith.constant 0 : index
    %279 = vector.load %arg10[%c0_64, %c0_65] : memref<8x32xf32, #tpu.memory_space<vmem>>, vector<8x32xf32>
    tpu.vector_store %arg10[%c0_64, %c0_65], %276 {strides = array<i32>} : memref<8x32xf32, #tpu.memory_space<vmem>>, vector<8x32xf32>,
    %c0_66 = arith.constant 0 : index
    %c0_67 = arith.constant 0 : index
    %280 = vector.load %arg12[%c0_66, %c0_67] : memref<64x32xf32, #tpu.memory_space<vmem>>, vector<64x32xf32>
    %281 = arith.truncf %280 : vector<64x32xf32> to vector<64x32xbf16>
    %c0_68 = arith.constant 0 : index
    %c0_69 = arith.constant 0 : index
    %282 = vector.load %arg7[%c0_68, %c0_69] : memref<32x32xbf16, #tpu.memory_space<vmem>>, vector<32x32xbf16>
    %cst_70 = arith.constant dense<0.000000e+00> : vector<64x32xf32>
    %283 = tpu.matmul %281, %282, %cst_70 {dimension_numbers = #tpu.dot_dimension_numbers<[1], [0], [0], [1], [0, 0, 1, 1], [], []>} : vector<64x32xbf16>, vector<32x32xbf16>, vector<64x32xf32> -> vector<64x32xf32>
    %c0_71 = arith.constant 0 : index
    %c0_72 = arith.constant 0 : index
    %284 = vector.load %arg8[%c0_71, %c0_72] : memref<1x32xf32, #tpu.memory_space<vmem>>, vector<1x32xf32>
    %285 = vector.broadcast %284 : vector<1x32xf32> to vector<64x32xf32>
    %286 = arith.addf %283, %285 : vector<64x32xf32>
    %287 = vector.shape_cast %286 : vector<64x32xf32> to vector<8x8x32xf32>
    %c0_73 = arith.constant 0 : index
    %c0_74 = arith.constant 0 : index
    %c0_75 = arith.constant 0 : index
    %288 = vector.load %arg9[%c0_73, %c0_74, %c0_75] : memref<8x8x32xf32, #tpu.memory_space<vmem>>, vector<8x8x32xf32>
    tpu.vector_store %arg9[%c0_73, %c0_74, %c0_75], %287 {strides = array<i32>} : memref<8x8x32xf32, #tpu.memory_space<vmem>>, vector<8x8x32xf32>,
    return
  }
  func.func @transform_0(%arg0: i32, %arg1: i32) -> (i32, i32, i32) {
    %c0_i32 = arith.constant 0 : i32
    %c0_i32_0 = arith.constant 0 : i32
    return %arg1, %arg0, %c0_i32 : i32, i32, i32
  }
  func.func @transform_1(%arg0: i32, %arg1: i32) -> (i32, i32) {
    %c0_i32 = arith.constant 0 : i32
    %c0_i32_0 = arith.constant 0 : i32
    %c0_i32_1 = arith.constant 0 : i32
    return %c0_i32, %c0_i32_0 : i32, i32
  }
  func.func @transform_2(%arg0: i32, %arg1: i32) -> (i32, i32) {
    %c0_i32 = arith.constant 0 : i32
    %c0_i32_0 = arith.constant 0 : i32
    %c0_i32_1 = arith.constant 0 : i32
    return %c0_i32, %c0_i32_0 : i32, i32
  }
  func.func @transform_3(%arg0: i32, %arg1: i32) -> (i32, i32) {
    %c0_i32 = arith.constant 0 : i32
    %c0_i32_0 = arith.constant 0 : i32
    %c0_i32_1 = arith.constant 0 : i32
    return %c0_i32, %c0_i32_0 : i32, i32
  }
  func.func @transform_4(%arg0: i32, %arg1: i32) -> (i32, i32) {
    %c0_i32 = arith.constant 0 : i32
    %c0_i32_0 = arith.constant 0 : i32
    %c0_i32_1 = arith.constant 0 : i32
    return %c0_i32, %c0_i32_0 : i32, i32
  }
  func.func @transform_5(%arg0: i32, %arg1: i32) -> (i32, i32) {
    %c0_i32 = arith.constant 0 : i32
    %c0_i32_0 = arith.constant 0 : i32
    %c0_i32_1 = arith.constant 0 : i32
    return %c0_i32, %c0_i32_0 : i32, i32
  }
  func.func @transform_6(%arg0: i32, %arg1: i32) -> (i32, i32) {
    %c0_i32 = arith.constant 0 : i32
    %c0_i32_0 = arith.constant 0 : i32
    %c0_i32_1 = arith.constant 0 : i32
    return %c0_i32, %c0_i32_0 : i32, i32
  }
  func.func @transform_7(%arg0: i32, %arg1: i32) -> (i32, i32, i32) {
    %c0_i32 = arith.constant 0 : i32
    %c0_i32_0 = arith.constant 0 : i32
    return %arg1, %arg0, %c0_i32 : i32, i32, i32
  }
}

</mosaic_0001>

<bundles_post_ra>
// kernel: tpu_custom_call.1
= control target key start
LH: loop header
LB: loop body
LE: loop exit
PB: predicated region body
PF: predicated region fallthrough
CT: control target
= control target key end

     0   :  { %vm67_vm0 = vcmask 1041408   ;;  %vm54_vm1 = vcmask 31744   ;;  %vm32_vm2 = vcmask 261120   ;;  %v1204_v14 = vmov 0.0   ;;  %s1506_s0 = inlined_call_operand.vmem [shape: f32[8,8,4], index: 0, kind: input, shape index: {}]   ;;  %s1507_s1 = inlined_call_operand.vmem [shape: bf16[4,96], index: 1, kind: input, shape index: {}]   ;;  %s1508_s2 = inlined_call_operand.vmem [shape: f32[1,96], index: 2, kind: input, shape index: {}]   ;;  %s1509_s3 = inlined_call_operand.vmem [shape: bf16[32,96], index: 3, kind: input, shape index: {}]   ;;  %s1510_s4 = inlined_call_operand.vmem [shape: f32[1,96], index: 4, kind: input, shape index: {}]   ;;  %s1511_s5 = inlined_call_operand.vmem [shape: bf16[32,32], index: 5, kind: input, shape index: {}]   ;;  %s1512_s6 = inlined_call_operand.vmem [shape: f32[1,32], index: 6, kind: input, shape index: {}]   ;;  %s1513_s7 = inlined_call_operand.hbm [shape: f32[8,8,32], index: 7, kind: output, shape index: {}]  }
   0x1   :  { %v46_v0 = vld [vmem:[%s1507_s1] sm:$0x3]  ;;  %v35_v2 = vld [vmem:[%s1506_s0 + $0x8] sm:$0xff]  ;;  %v36_v7 = vld [vmem:[%s1506_s0 + $0x10] sm:$0xff]  ;;  %33 = vst.msk [vmem:[#allocation2] sm:$0xff] %vm32_vm2, %v1204_v14  ;;  %vm1205_vm3 = vmmov 0  }
   0x2   :  { %v34_v1 = vld [vmem:[%s1506_s0] sm:$0xff]  ;;  %1118 = vmatprep.subr.msk.bf16.mxu0 %vm67_vm0, %v46_v0  ;;  %1119 = vmatprep.subr.msk.bf16.mxu1 %vm67_vm0, %v46_v0  ;;  %v69_v3 = vsel %vm67_vm0, %v46_v0, 0  ;;  %v39_v6 = vld [vmem:[%s1506_s0 + $0x28] sm:$0xff]  ;;  %v37_v9 = vld [vmem:[%s1506_s0 + $0x18] sm:$0xff] }
   0x3   :  { %v42_v4 = vpack.c.bf16 %v35_v2, %v34_v1  ;;  %v38_v5 = vld [vmem:[%s1506_s0 + $0x20] sm:$0xff]  ;;  %1031 = vmatpush3.bf16.msra.mxu0 %v69_v3  ;;  %1117 = vmatpush3.bf16.msra.mxu1 %v69_v3  ;;  %v40_v10 = vld [vmem:[%s1506_s0 + $0x30] sm:$0xff]  ;;  %v41_v11 = vld [vmem:[%s1506_s0 + $0x38] sm:$0xff]  ;;  %v43_v12 = vpack.c.bf16 %v37_v9, %v36_v7 }
   0x4   :  { %v44_v8 = vpack.c.bf16 %v39_v6, %v38_v5  ;;  %v45_v13 = vpack.c.bf16 %v41_v11, %v40_v10  ;;  %1040 = vmatprep.subr.bf16.mxu1 %v1204_v14  ;;  %v1284_v15 = vld [vmem:[%s1509_s3] sm:$0xff]   ;;  %1056 = vmatprep.subr.bf16.mxu0 %v1204_v14  ;;  %v1296_v16 = vld [vmem:[%s1509_s3 + $0x8] sm:$0xff]  }
   0x5   :  { %1032 = vmatprep.mubr.msk.bf16.mxu0 %vm54_vm1, %v42_v4 }
   0x6   :  { %1036 = vmatprep.mubr.msk.bf16.mxu1 %vm54_vm1, %v44_v8  ;;  %1033 = vmatmul.mubr.msk.bf16.vlgmr.msra.gmra.mrb[0].mxu0 %vm54_vm1, %v43_v12 }
   0x7   :  { %1037 = vmatmul.mubr.msk.bf16.vlgmr.msra.gmra.mrb[0].mxu1 %vm54_vm1, %v45_v13 }
   0x8   :  { %1041 = vmatpush3.bf16.msra.mxu1 %v1284_v15  ;;  %1044 = vmatprep.mubr.msk.bf16.mxu1 %vm1205_vm3, %v1204_v14 }
   0x9   :  { %12 = vsyncpa [#allocation6], 0  ;;  %1042 = vmatprep.subr.bf16.mxu1 %v1204_v14  ;;  %1057 = vmatpush3.bf16.msra.mxu0 %v1284_v15  ;;  %v1306_v17 = vld [vmem:[#allocation2] sm:$0xff]  ;;  %vm136_vm4 = vcmask 785408   ;;  %s1206_s23 = smov 64   ;;  %s1208_s24 = smov 96  }
   0xa   :  { %1058 = vmatprep.subr.bf16.mxu0 %v1204_v14  ;;  %1060 = vmatprep.mubr.msk.bf16.mxu0 %vm1205_vm3, %v1204_v14  ;;  %v152_v18 = vpack.c.bf16 %v1306_v17, %v1306_v17  ;;  %v964_v19 = vld [vmem:[%s1508_s2] ss:$0 sm:$0xff]  ;;  %s1209_s30 = smov [#allocation5]  }
   0xb   :  { %v1333_v36 = vld [vmem:[%s1510_s4] ss:$0 sm:$0xff]  ;;  %s1207_s4 = smov 32   ;;  %s953_s8 = sshll.u32 %s1209_s30, 4  ;;  %s954_s8 = int_to_ptr.vmem [resolvable:$true] %s953_s8 }
   0xc   :  { %1043 = vmatpush3.bf16.msra.mxu1 %v1296_v16  ;;  %p1185_p1 = scmp.lt.s32.totalorder %s954_s8, %s954_s8 }
   0xd   :  { %1048 = vmatprep.subr.bf16.mxu1 %v1204_v14  ;;  %1059 = vmatpush3.bf16.msra.mxu0 %v1296_v16 }
   0xe   :  { %1072 = vmatprep.subr.bf16.mxu0 %v1204_v14 }
   0xf   :  { %1045 = vmatmul.mubr.msk.bf16.vlgmr.msra.gmra.mrb[4].mxu1 %vm32_vm2, %v152_v18 }
  0x10   :  { %1049 = vmatpush3.bf16.msra.mxu1 %v1284_v15  ;;  %1052 = vmatprep.mubr.msk.bf16.mxu1 %vm1205_vm3, %v1204_v14 }
  0x11   :  { %1050 = vmatprep.subr.bf16.mxu1 %v1204_v14 }
  0x14   :  { %1051 = vmatpush3.bf16.msra.mxu1 %v1296_v16 }
  0x15   :  { %1064 = vmatprep.subr.bf16.mxu1 %v1204_v14 }
  0xd9   :  { %v1034_v20 = vpop.f32.mrb[0].mxu0 }
  0xda   :  { %v1038_v21 = vpop.f32.mrb[0].mxu1  ;;  %v114_v22 = vadd.f32 %v1034_v20, %v964_v19  ;;  %v105_v24 = vpop.f32.mrb[1].mxu0 }
  0xdb   :  { %v130_v23 = vadd.f32 %v1038_v21, %v964_v19  ;;  %v121_v25 = vpop.f32.mrb[1].mxu1  ;;  %v106_v26 = vadd.f32 %v964_v19, %v105_v24  ;;  %v1035_v29 = vpop.f32.mrb[2].mxu0 }
  0xdc   :  { %v122_v27 = vadd.f32 %v964_v19, %v121_v25  ;;  %v1039_v28 = vpop.f32.mrb[2].mxu1  ;;  %139 = vst.msk [vmem:[#allocation3 + $0x10] sm:$0xff] %vm136_vm4, %v114_v22  ;;  %v117_v32 = vadd.f32 %v1035_v29, %v964_v19  ;;  %v108_v33 = vpop.f32.mrb[3].mxu0 }
  0xdd   :  { %143 = vst.msk [vmem:[#allocation3 + $0x30] sm:$0xff] %vm136_vm4, %v130_v23  ;;  %v133_v30 = vadd.f32 %v1039_v28, %v964_v19  ;;  %v124_v31 = vpop.f32.mrb[3].mxu1  ;;  %137 = vst.msk [vmem:[#allocation3] sm:$0xff] %vm136_vm4, %v106_v26  ;;  %v109_v35 = vadd.f32 %v964_v19, %v108_v33 }
  0xde   :  { %141 = vst.msk [vmem:[#allocation3 + $0x20] sm:$0xff] %vm136_vm4, %v122_v27  ;;  %v125_v34 = vadd.f32 %v964_v19, %v124_v31  ;;  %140 = vst.msk [vmem:[#allocation3 + $0x18] sm:$0xff] %vm136_vm4, %v117_v32 }
  0xdf   :  { %144 = vst.msk [vmem:[#allocation3 + $0x38] sm:$0xff] %vm136_vm4, %v133_v30  ;;  %138 = vst.msk [vmem:[#allocation3 + $0x8] sm:$0xff] %vm136_vm4, %v109_v35 }
  0xe0   :  { %142 = vst.msk [vmem:[#allocation3 + $0x28] sm:$0xff] %vm136_vm4, %v125_v34 }
  0xe2   :  { %v209_v37 = vpop.f32.mrb[4].mxu1 }
  0xe3   :  { %v210_v38 = vadd.f32 %v1333_v36, %v209_v37  ;;  %v1046_v39 = vpop.f32.mrb[5].mxu1  ;;  %v335_v28 = vld [vmem:[#allocation3 + $0x10] sm:$0xff] }
  0xe4   :  { %v212_v40 = vpop.f32.mrb[6].mxu1  ;;  %v151_v42 = vld [vmem:[#allocation3] sm:$0xff] }
  0xe5   :  { %223 = vrot.lane.b32.xlu0 %v210_v38, %s1206_s23  ;;  %v1047_v41 = vpop.f32.mrb[7].mxu1  ;;  %v215_v43 = vadd.f32 %v210_v38, %v151_v42 }
  0xe6   :  { %v253_v2 = vld [vmem:[#allocation3 + $0x8] sm:$0xff] }
  0xe7   :  { %v973_v44 = vmul.f32 -1.442695, %v215_v43 }
  0xe9   :  { %1132 = vpow2.f32 %v973_v44 }
  0xf3   :  { %v1133_v45 = vpop.eup %1132 }
  0xf4   :  { %v219_v46 = vadd.f32 1.0, %v1133_v45 }
  0xf6   :  { %1134 = vrcp.f32 %v219_v46 }
 0x100   :  { %v1135_v47 = vpop.eup %1134 }
 0x157   :  { %v224_v48 = vpop.permute.xlu0 %223 }
 0x158   :  { %v226_v49 = vmul.f32 %v1135_v47, %v224_v48 }
 0x15a   :  { %228 = vrot.lane.b32.xlu0 %v226_v49, %s1206_s23 }
 0x1cc   :  { %v229_v50 = vpop.permute.xlu0 %228 }
 0x1cd   :  { %v231_v51 = vadd.f32 %v229_v50, %v151_v42 }
 0x1cf   :  { %1136 = vtanh.f32 %v231_v51 }
 0x1d9   :  { %v1137_v52 = vpop.eup %1136 }
 0x1da   :  { %234 = vrot.lane.b32.xlu1 %v1137_v52, %s1206_s23 }
 0x24c   :  { %v235_v53 = vpop.permute.xlu1 %234 }
 0x24d   :  { %v237_v54 = vsub.f32 %v1306_v17, %v235_v53 }
 0x24f   :  { %239 = vrot.lane.b32.xlu1 %v237_v54, %s1207_s4 }
 0x2c1   :  { %v240_v55 = vpop.permute.xlu1 %239 }
 0x2c2   :  { %v242_v56 = vmul.f32 %v1135_v47, %v240_v55 }
 0x2c4   :  { %244 = vrot.lane.b32.xlu0 %v242_v56, %s1207_s4 }
 0x336   :  { %v245_v57 = vpop.permute.xlu0 %244 }
 0x337   :  { %v1343_v58 = vadd.f32 %v1137_v52, %v245_v57  ;;  %v417_v52 = vld [vmem:[#allocation3 + $0x18] sm:$0xff] }
 0x339   :  { %v254_v59 = vpack.c.bf16 %v1343_v58, %v1343_v58 }
 0x33b   :  { %256 = vrot.lane.b32.xlu1 %v254_v59, %s1206_s23 }
 0x3ad   :  { %v257_v60 = vpop.permute.xlu1 %256 }
 0x3ae   :  { %1053 = vmatmul.mubr.msk.bf16.vlgmr.msra.gmra.mrb[8].mxu1 %vm32_vm2, %v257_v60 }
 0x3af   :  { %1065 = vmatpush3.bf16.msra.mxu1 %v1284_v15  ;;  %1068 = vmatprep.mubr.msk.bf16.mxu1 %vm1205_vm3, %v1204_v14 }
 0x3b0   :  { %1066 = vmatprep.subr.bf16.mxu1 %v1204_v14 }
 0x3b3   :  { %1067 = vmatpush3.bf16.msra.mxu1 %v1296_v16 }
 0x3b4   :  { %1080 = vmatprep.subr.bf16.mxu1 %v1204_v14 }
 0x481   :  { %v295_v61 = vpop.f32.mrb[8].mxu1 }
 0x482   :  { %v296_v62 = vadd.f32 %v1333_v36, %v295_v61  ;;  %v1054_v63 = vpop.f32.mrb[9].mxu1 }
 0x483   :  { %v298_v0 = vpop.f32.mrb[10].mxu1 }
 0x484   :  { %309 = vrot.lane.b32.xlu0 %v296_v62, %s1206_s23  ;;  %v1055_v1 = vpop.f32.mrb[11].mxu1  ;;  %v301_v3 = vadd.f32 %v296_v62, %v253_v2 }
 0x486   :  { %v975_v4 = vmul.f32 -1.442695, %v301_v3 }
 0x488   :  { %1138 = vpow2.f32 %v975_v4 }
 0x492   :  { %v1139_v5 = vpop.eup %1138 }
 0x493   :  { %v305_v6 = vadd.f32 1.0, %v1139_v5 }
 0x495   :  { %1140 = vrcp.f32 %v305_v6 }
 0x49f   :  { %v1141_v7 = vpop.eup %1140 }
 0x4f6   :  { %v310_v8 = vpop.permute.xlu0 %309 }
 0x4f7   :  { %v312_v9 = vmul.f32 %v1141_v7, %v310_v8 }
 0x4f9   :  { %314 = vrot.lane.b32.xlu1 %v312_v9, %s1206_s23 }
 0x56b   :  { %v315_v10 = vpop.permute.xlu1 %314 }
 0x56c   :  { %v317_v11 = vadd.f32 %v315_v10, %v253_v2 }
 0x56e   :  { %1142 = vtanh.f32 %v317_v11 }
 0x578   :  { %v1143_v12 = vpop.eup %1142 }
 0x579   :  { %v319_v13 = vsub.f32 %v1343_v58, %v1143_v12 }
 0x57b   :  { %321 = vrot.lane.b32.xlu0 %v319_v13, %s1208_s24 }
 0x5ed   :  { %v322_v17 = vpop.permute.xlu0 %321 }
 0x5ee   :  { %v324_v18 = vmul.f32 %v1141_v7, %v322_v17 }
 0x5f0   :  { %326 = vrot.lane.b32.xlu1 %v324_v18, %s1207_s4 }
 0x662   :  { %v327_v19 = vpop.permute.xlu1 %326 }
 0x663   :  { %v1361_v20 = vadd.f32 %v1143_v12, %v327_v19  ;;  %v499_v12 = vld [vmem:[#allocation3 + $0x20] sm:$0xff] }
 0x665   :  { %v336_v21 = vpack.c.bf16 %v1361_v20, %v1361_v20 }
 0x667   :  { %338 = vrot.lane.b32.xlu0 %v336_v21, %s1206_s23 }
 0x6d9   :  { %v339_v22 = vpop.permute.xlu0 %338 }
 0x6da   :  { %1061 = vmatmul.mubr.msk.bf16.vlgmr.msra.gmra.mrb[4].mxu0 %vm32_vm2, %v339_v22 }
 0x6db   :  { %1073 = vmatpush3.bf16.msra.mxu0 %v1284_v15  ;;  %1076 = vmatprep.mubr.msk.bf16.mxu0 %vm1205_vm3, %v1204_v14 }
 0x6dc   :  { %1074 = vmatprep.subr.bf16.mxu0 %v1204_v14 }
 0x6df   :  { %1075 = vmatpush3.bf16.msra.mxu0 %v1296_v16 }
 0x6e0   :  { %1088 = vmatprep.subr.bf16.mxu0 %v1204_v14 }
 0x7ad   :  { %v377_v23 = vpop.f32.mrb[4].mxu0 }
 0x7ae   :  { %v378_v24 = vadd.f32 %v1333_v36, %v377_v23  ;;  %v1062_v25 = vpop.f32.mrb[5].mxu0 }
 0x7af   :  { %v380_v26 = vpop.f32.mrb[6].mxu0 }
 0x7b0   :  { %391 = vrot.lane.b32.xlu1 %v378_v24, %s1206_s23  ;;  %v1063_v27 = vpop.f32.mrb[7].mxu0  ;;  %v383_v29 = vadd.f32 %v378_v24, %v335_v28 }
 0x7b2   :  { %v977_v30 = vmul.f32 -1.442695, %v383_v29 }
 0x7b4   :  { %1144 = vpow2.f32 %v977_v30 }
 0x7be   :  { %v1145_v31 = vpop.eup %1144 }
 0x7bf   :  { %v387_v32 = vadd.f32 1.0, %v1145_v31 }
 0x7c1   :  { %1146 = vrcp.f32 %v387_v32 }
 0x7cb   :  { %v1147_v33 = vpop.eup %1146 }
 0x822   :  { %v392_v34 = vpop.permute.xlu1 %391 }
 0x823   :  { %v394_v35 = vmul.f32 %v1147_v33, %v392_v34 }
 0x825   :  { %396 = vrot.lane.b32.xlu0 %v394_v35, %s1206_s23 }
 0x897   :  { %v397_v37 = vpop.permute.xlu0 %396 }
 0x898   :  { %v399_v38 = vadd.f32 %v397_v37, %v335_v28 }
 0x89a   :  { %1148 = vtanh.f32 %v399_v38 }
 0x8a4   :  { %v1149_v39 = vpop.eup %1148 }
 0x8a5   :  { %v401_v40 = vsub.f32 %v1361_v20, %v1149_v39 }
 0x8a7   :  { %403 = vrot.lane.b32.xlu1 %v401_v40, %s1208_s24  ;;  %v581_v40 = vld [vmem:[#allocation3 + $0x28] sm:$0xff] }
 0x919   :  { %v404_v41 = vpop.permute.xlu1 %403 }
 0x91a   :  { %v406_v42 = vmul.f32 %v1147_v33, %v404_v41 }
 0x91c   :  { %408 = vrot.lane.b32.xlu0 %v406_v42, %s1207_s4 }
 0x98e   :  { %v409_v43 = vpop.permute.xlu0 %408 }
 0x98f   :  { %v1379_v44 = vadd.f32 %v1149_v39, %v409_v43 }
 0x991   :  { %v418_v45 = vpack.c.bf16 %v1379_v44, %v1379_v44 }
 0x993   :  { %420 = vrot.lane.b32.xlu1 %v418_v45, %s1206_s23 }
 0xa05   :  { %v421_v46 = vpop.permute.xlu1 %420 }
 0xa06   :  { %1069 = vmatmul.mubr.msk.bf16.vlgmr.msra.gmra.mrb[12].mxu1 %vm32_vm2, %v421_v46 }
 0xa07   :  { %1081 = vmatpush3.bf16.msra.mxu1 %v1284_v15  ;;  %1084 = vmatprep.mubr.msk.bf16.mxu1 %vm1205_vm3, %v1204_v14 }
 0xa08   :  { %1082 = vmatprep.subr.bf16.mxu1 %v1204_v14 }
 0xa0b   :  { %1083 = vmatpush3.bf16.msra.mxu1 %v1296_v16 }
 0xa0c   :  { %1096 = vmatprep.subr.bf16.mxu1 %v1204_v14 }
 0xad9   :  { %v459_v47 = vpop.f32.mrb[12].mxu1 }
 0xada   :  { %v460_v48 = vadd.f32 %v1333_v36, %v459_v47  ;;  %v1070_v49 = vpop.f32.mrb[13].mxu1 }
 0xadb   :  { %v462_v50 = vpop.f32.mrb[14].mxu1 }
 0xadc   :  { %473 = vrot.lane.b32.xlu0 %v460_v48, %s1206_s23  ;;  %v1071_v51 = vpop.f32.mrb[15].mxu1  ;;  %v465_v53 = vadd.f32 %v460_v48, %v417_v52 }
 0xade   :  { %v979_v54 = vmul.f32 -1.442695, %v465_v53 }
 0xae0   :  { %1150 = vpow2.f32 %v979_v54 }
 0xaea   :  { %v1151_v55 = vpop.eup %1150 }
 0xaeb   :  { %v469_v56 = vadd.f32 1.0, %v1151_v55 }
 0xaed   :  { %1152 = vrcp.f32 %v469_v56 }
 0xaf7   :  { %v1153_v57 = vpop.eup %1152 }
 0xb4e   :  { %v474_v59 = vpop.permute.xlu0 %473 }
 0xb4f   :  { %v476_v60 = vmul.f32 %v1153_v57, %v474_v59 }
 0xb51   :  { %478 = vrot.lane.b32.xlu1 %v476_v60, %s1206_s23 }
 0xbc3   :  { %v479_v61 = vpop.permute.xlu1 %478 }
 0xbc4   :  { %v481_v62 = vadd.f32 %v479_v61, %v417_v52 }
 0xbc6   :  { %1154 = vtanh.f32 %v481_v62  ;;  %v663_v62 = vld [vmem:[#allocation3 + $0x30] sm:$0xff] }
 0xbd0   :  { %v1155_v63 = vpop.eup %1154 }
 0xbd1   :  { %v483_v0 = vsub.f32 %v1379_v44, %v1155_v63 }
 0xbd3   :  { %485 = vrot.lane.b32.xlu0 %v483_v0, %s1208_s24 }
 0xc45   :  { %v486_v1 = vpop.permute.xlu0 %485 }
 0xc46   :  { %v488_v2 = vmul.f32 %v1153_v57, %v486_v1 }
 0xc48   :  { %490 = vrot.lane.b32.xlu1 %v488_v2, %s1207_s4 }
 0xcba   :  { %v491_v3 = vpop.permute.xlu1 %490 }
 0xcbb   :  { %v1397_v4 = vadd.f32 %v1155_v63, %v491_v3 }
 0xcbd   :  { %v500_v5 = vpack.c.bf16 %v1397_v4, %v1397_v4 }
 0xcbf   :  { %502 = vrot.lane.b32.xlu0 %v500_v5, %s1206_s23 }
 0xd31   :  { %v503_v6 = vpop.permute.xlu0 %502 }
 0xd32   :  { %1077 = vmatmul.mubr.msk.bf16.vlgmr.msra.gmra.mrb[8].mxu0 %vm32_vm2, %v503_v6 }
 0xd33   :  { %1089 = vmatpush3.bf16.msra.mxu0 %v1284_v15  ;;  %1092 = vmatprep.mubr.msk.bf16.mxu0 %vm1205_vm3, %v1204_v14 }
 0xd34   :  { %1090 = vmatprep.subr.bf16.mxu0 %v1204_v14 }
 0xd37   :  { %1091 = vmatpush3.bf16.msra.mxu0 %v1296_v16 }
 0xe05   :  { %v541_v7 = vpop.f32.mrb[8].mxu0 }
 0xe06   :  { %v542_v8 = vadd.f32 %v1333_v36, %v541_v7  ;;  %v1078_v9 = vpop.f32.mrb[9].mxu0 }
 0xe07   :  { %v544_v10 = vpop.f32.mrb[10].mxu0 }
 0xe08   :  { %555 = vrot.lane.b32.xlu1 %v542_v8, %s1206_s23  ;;  %v1079_v11 = vpop.f32.mrb[11].mxu0  ;;  %v547_v13 = vadd.f32 %v542_v8, %v499_v12 }
 0xe0a   :  { %v981_v17 = vmul.f32 -1.442695, %v547_v13 }
 0xe0c   :  { %1156 = vpow2.f32 %v981_v17 }
 0xe16   :  { %v1157_v18 = vpop.eup %1156 }
 0xe17   :  { %v551_v19 = vadd.f32 1.0, %v1157_v18 }
 0xe19   :  { %1158 = vrcp.f32 %v551_v19 }
 0xe23   :  { %v1159_v21 = vpop.eup %1158 }
 0xe7a   :  { %v556_v22 = vpop.permute.xlu1 %555 }
 0xe7b   :  { %v558_v23 = vmul.f32 %v1159_v21, %v556_v22 }
 0xe7d   :  { %560 = vrot.lane.b32.xlu0 %v558_v23, %s1206_s23 }
 0xeef   :  { %v561_v24 = vpop.permute.xlu0 %560 }
 0xef0   :  { %v563_v25 = vadd.f32 %v561_v24, %v499_v12 }
 0xef2   :  { %1160 = vtanh.f32 %v563_v25 }
 0xefc   :  { %v1161_v26 = vpop.eup %1160 }
 0xefd   :  { %v565_v27 = vsub.f32 %v1397_v4, %v1161_v26 }
 0xeff   :  { %567 = vrot.lane.b32.xlu1 %v565_v27, %s1208_s24 }
 0xf71   :  { %v568_v28 = vpop.permute.xlu1 %567 }
 0xf72   :  { %v570_v29 = vmul.f32 %v1159_v21, %v568_v28 }
 0xf74   :  { %572 = vrot.lane.b32.xlu0 %v570_v29, %s1207_s4 }
 0xfe6   :  { %v573_v30 = vpop.permute.xlu0 %572 }
 0xfe7   :  { %v1414_v31 = vadd.f32 %v1161_v26, %v573_v30  ;;  %v745_v26 = vld [vmem:[#allocation3 + $0x38] sm:$0xff] }
 0xfe9   :  { %v582_v32 = vpack.c.bf16 %v1414_v31, %v1414_v31 }
 0xfeb   :  { %584 = vrot.lane.b32.xlu1 %v582_v32, %s1206_s23 }
0x105d   :  { %v585_v33 = vpop.permute.xlu1 %584 }
0x105e   :  { %1085 = vmatmul.mubr.msk.bf16.vlgmr.msra.gmra.mrb[16].mxu1 %vm32_vm2, %v585_v33 }
0x105f   :  { %1097 = vmatpush3.bf16.msra.mxu1 %v1284_v15  ;;  %1100 = vmatprep.mubr.msk.bf16.mxu1 %vm1205_vm3, %v1204_v14 }
0x1060   :  { %1098 = vmatprep.subr.bf16.mxu1 %v1204_v14 }
0x1063   :  { %1099 = vmatpush3.bf16.msra.mxu1 %v1296_v16 }
0x1131   :  { %v623_v34 = vpop.f32.mrb[16].mxu1 }
0x1132   :  { %v624_v35 = vadd.f32 %v1333_v36, %v623_v34  ;;  %v1086_v37 = vpop.f32.mrb[17].mxu1 }
0x1133   :  { %v626_v38 = vpop.f32.mrb[18].mxu1 }
0x1134   :  { %637 = vrot.lane.b32.xlu0 %v624_v35, %s1206_s23  ;;  %v1087_v39 = vpop.f32.mrb[19].mxu1  ;;  %v629_v41 = vadd.f32 %v624_v35, %v581_v40 }
0x1135   :  { %v1130_v39 = vld [vmem:[%s1511_s5] sm:$0xff]  }
0x1136   :  { %v983_v42 = vmul.f32 -1.442695, %v629_v41  ;;  %1104 = vmatprep.subr.bf16.mxu0 %v1130_v39 }
0x1138   :  { %1162 = vpow2.f32 %v983_v42 }
0x1142   :  { %v1163_v15 = vpop.eup %1162 }
0x1143   :  { %v633_v43 = vadd.f32 1.0, %v1163_v15 }
0x1145   :  { %1164 = vrcp.f32 %v633_v43 }
0x114f   :  { %v1165_v45 = vpop.eup %1164 }
0x11a6   :  { %v638_v46 = vpop.permute.xlu0 %637 }
0x11a7   :  { %v640_v14 = vmul.f32 %v1165_v45, %v638_v46 }
0x11a9   :  { %642 = vrot.lane.b32.xlu1 %v640_v14, %s1206_s23 }
0x121b   :  { %v643_v16 = vpop.permute.xlu1 %642 }
0x121c   :  { %v645_v47 = vadd.f32 %v643_v16, %v581_v40 }
0x121e   :  { %1166 = vtanh.f32 %v645_v47 }
0x1228   :  { %v1167_v48 = vpop.eup %1166 }
0x1229   :  { %v647_v49 = vsub.f32 %v1414_v31, %v1167_v48 }
0x122b   :  { %649 = vrot.lane.b32.xlu0 %v647_v49, %s1208_s24 }
0x129d   :  { %v650_v50 = vpop.permute.xlu0 %649 }
0x129e   :  { %v652_v51 = vmul.f32 %v1165_v45, %v650_v50 }
0x12a0   :  { %654 = vrot.lane.b32.xlu1 %v652_v51, %s1207_s4 }
0x1312   :  { %v655_v52 = vpop.permute.xlu1 %654 }
0x1313   :  { %v1431_v53 = vadd.f32 %v1167_v48, %v655_v52 }
0x1315   :  { %v664_v54 = vpack.c.bf16 %v1431_v53, %v1431_v53 }
0x1317   :  { %666 = vrot.lane.b32.xlu0 %v664_v54, %s1206_s23 }
0x1389   :  { %v667_v55 = vpop.permute.xlu0 %666 }
0x138a   :  { %1093 = vmatmul.mubr.msk.bf16.vlgmr.msra.gmra.mrb[12].mxu0 %vm32_vm2, %v667_v55 }
0x138b   :  { %1105 = vmatpush3.bf16.msra.mxu0 %v1130_v39 }
0x145d   :  { %v705_v56 = vpop.f32.mrb[12].mxu0 }
0x145e   :  { %v706_v57 = vadd.f32 %v1333_v36, %v705_v56  ;;  %v1094_v59 = vpop.f32.mrb[13].mxu0 }
0x145f   :  { %v708_v60 = vpop.f32.mrb[14].mxu0  ;;  %v988_v59 = vld [vmem:[%s1512_s6] ss:$0 sm:$0xff]  ;;  %s1180_s6 = scalar_lea.vmem %s954_s8, 1024 }
0x1460   :  { %719 = vrot.lane.b32.xlu1 %v706_v57, %s1206_s23  ;;  %v1095_v61 = vpop.f32.mrb[15].mxu0  ;;  %v711_v63 = vadd.f32 %v706_v57, %v663_v62  ;;  %p1181_p0 = scmp.ne.s32.totalorder %s954_s8, %s1180_s6  ;;  %p1186_p2 = scmp.lt.s32.totalorder %s1180_s6, %s1180_s6 }
0x1462   :  { %v985_v0 = vmul.f32 -1.442695, %v711_v63  ;;  %p1187_p3 = por %p1186_p2, %p1185_p1 }
0x1464   :  { %1168 = vpow2.f32 %v985_v0  ;;  %p1188_p4 = pnand %p1187_p3, %p1181_p0 }
0x146e   :  { %v1169_v1 = vpop.eup %1168 }
0x146f   :  { %v715_v2 = vadd.f32 1.0, %v1169_v1 }
0x1471   :  { %1170 = vrcp.f32 %v715_v2 }
0x147b   :  { %v1171_v3 = vpop.eup %1170 }
0x14d2   :  { %v720_v5 = vpop.permute.xlu1 %719 }
0x14d3   :  { %v722_v6 = vmul.f32 %v1171_v3, %v720_v5 }
0x14d5   :  { %724 = vrot.lane.b32.xlu0 %v722_v6, %s1206_s23 }
0x1547   :  { %v725_v7 = vpop.permute.xlu0 %724 }
0x1548   :  { %v727_v8 = vadd.f32 %v725_v7, %v663_v62 }
0x154a   :  { %1172 = vtanh.f32 %v727_v8 }
0x1554   :  { %v1173_v9 = vpop.eup %1172 }
0x1555   :  { %v729_v10 = vsub.f32 %v1431_v53, %v1173_v9 }
0x1557   :  { %731 = vrot.lane.b32.xlu1 %v729_v10, %s1208_s24 }
0x15c9   :  { %v732_v11 = vpop.permute.xlu1 %731 }
0x15ca   :  { %v734_v12 = vmul.f32 %v1171_v3, %v732_v11 }
0x15cc   :  { %736 = vrot.lane.b32.xlu0 %v734_v12, %s1207_s4 }
0x163e   :  { %v737_v13 = vpop.permute.xlu0 %736 }
0x163f   :  { %v739_v17 = vadd.f32 %v1173_v9, %v737_v13 }
0x1641   :  { %v746_v18 = vpack.c.bf16 %v739_v17, %v739_v17 }
0x1643   :  { %748 = vrot.lane.b32.xlu1 %v746_v18, %s1206_s23 }
0x16b5   :  { %v749_v19 = vpop.permute.xlu1 %748 }
0x16b6   :  { %1101 = vmatmul.mubr.msk.bf16.vlgmr.msra.gmra.mrb[20].mxu1 %vm32_vm2, %v749_v19 }
0x1789   :  { %v787_v21 = vpop.f32.mrb[20].mxu1 }
0x178a   :  { %v788_v22 = vadd.f32 %v1333_v36, %v787_v21  ;;  %v1102_v23 = vpop.f32.mrb[21].mxu1 }
0x178b   :  { %v790_v24 = vpop.f32.mrb[22].mxu1 }
0x178c   :  { %801 = vrot.lane.b32.xlu0 %v788_v22, %s1206_s23  ;;  %v1103_v25 = vpop.f32.mrb[23].mxu1  ;;  %v793_v27 = vadd.f32 %v788_v22, %v745_v26 }
0x178e   :  { %v987_v28 = vmul.f32 -1.442695, %v793_v27 }
0x1790   :  { %1174 = vpow2.f32 %v987_v28 }
0x179a   :  { %v1175_v29 = vpop.eup %1174 }
0x179b   :  { %v797_v30 = vadd.f32 1.0, %v1175_v29 }
0x179d   :  { %1176 = vrcp.f32 %v797_v30 }
0x17a7   :  { %v1177_v32 = vpop.eup %1176 }
0x17fe   :  { %v802_v33 = vpop.permute.xlu0 %801 }
0x17ff   :  { %v804_v34 = vmul.f32 %v1177_v32, %v802_v33 }
0x1801   :  { %806 = vrot.lane.b32.xlu1 %v804_v34, %s1206_s23 }
0x1873   :  { %v807_v35 = vpop.permute.xlu1 %806 }
0x1874   :  { %v809_v37 = vadd.f32 %v807_v35, %v745_v26 }
0x1876   :  { %1178 = vtanh.f32 %v809_v37 }
0x1880   :  { %v1179_v36 = vpop.eup %1178 }
0x1881   :  { %v811_v38 = vsub.f32 %v739_v17, %v1179_v36 }
0x1883   :  { %813 = vrot.lane.b32.xlu0 %v811_v38, %s1208_s24 }
0x1887   :  { %249 = vrot.lane.b32.xlu0 %v1343_v58, %s1206_s23  ;;  %v1131_v58 = vld [vmem:[%s1511_s5 + $0x8] sm:$0xff]  }
0x1888   :  { %1106 = vmatprep.subr.bf16.mxu0 %v1131_v58 }
0x1889   :  { %1107 = vmatpush3.bf16.msra.mxu0 %v1131_v58 }
0x188b   :  { %413 = vrot.lane.b32.xlu0 %v1379_v44, %s1206_s23 }
0x188f   :  { %577 = vrot.lane.b32.xlu0 %v1414_v31, %s1206_s23 }
0x1893   :  { %741 = vrot.lane.b32.xlu0 %v739_v17, %s1206_s23 }
0x18f5   :  { %v814_v40 = vpop.permute.xlu0 %813 }
0x18f6   :  { %v816_v41 = vmul.f32 %v1177_v32, %v814_v40 }
0x18f8   :  { %818 = vrot.lane.b32.xlu1 %v816_v41, %s1207_s4 }
0x18f9   :  { %v250_v44 = vpop.permute.xlu0 %249 }
0x18fa   :  { %252 = vst.msk [vmem:[#allocation4] sm:$0xff] %vm32_vm2, %v250_v44 }
0x18fc   :  { %331 = vrot.lane.b32.xlu1 %v1361_v20, %s1206_s23 }
0x18fd   :  { %v414_v31 = vpop.permute.xlu0 %413 }
0x18fe   :  { %416 = vst.msk [vmem:[#allocation4 + $0x10] sm:$0xff] %vm32_vm2, %v414_v31 }
0x1900   :  { %495 = vrot.lane.b32.xlu1 %v1397_v4, %s1206_s23 }
0x1901   :  { %v578_v42 = vpop.permute.xlu0 %577  ;;  %v828_v14 = vld [vmem:[#allocation4] sm:$0xff] }
0x1902   :  { %580 = vst.msk [vmem:[#allocation4 + $0x20] sm:$0xff] %vm32_vm2, %v578_v42 }
0x1904   :  { %659 = vrot.lane.b32.xlu1 %v1431_v53, %s1206_s23 }
0x1905   :  { %v742_v15 = vpop.permute.xlu0 %741  ;;  %v830_v48 = vld [vmem:[#allocation4 + $0x10] sm:$0xff] }
0x1906   :  { %744 = vst.msk [vmem:[#allocation4 + $0x30] sm:$0xff] %vm32_vm2, %v742_v15 }
0x1909   :  { %v832_v51 = vld [vmem:[#allocation4 + $0x20] sm:$0xff] }
0x190d   :  { %v834_v55 = vld [vmem:[#allocation4 + $0x30] sm:$0xff] }
0x196a   :  { %v819_v43 = vpop.permute.xlu1 %818 }
0x196b   :  { %v821_v45 = vadd.f32 %v1179_v36, %v819_v43 }
0x196d   :  { %823 = vrot.lane.b32.xlu1 %v821_v45, %s1206_s23 }
0x196e   :  { %v332_v20 = vpop.permute.xlu1 %331 }
0x196f   :  { %334 = vst.msk [vmem:[#allocation4 + $0x8] sm:$0xff] %vm32_vm2, %v332_v20 }
0x1972   :  { %v496_v46 = vpop.permute.xlu1 %495 }
0x1973   :  { %498 = vst.msk [vmem:[#allocation4 + $0x18] sm:$0xff] %vm32_vm2, %v496_v46 }
0x1976   :  { %v660_v4 = vpop.permute.xlu1 %659  ;;  %v829_v16 = vld [vmem:[#allocation4 + $0x8] sm:$0xff] }
0x1977   :  { %662 = vst.msk [vmem:[#allocation4 + $0x28] sm:$0xff] %vm32_vm2, %v660_v4  ;;  %v836_v47 = vpack.c.bf16 %v829_v16, %v828_v14 }
0x1979   :  { %1108 = vmatprep.mubr.msk.bf16.mxu0 %vm32_vm2, %v836_v47 }
0x197a   :  { %v831_v49 = vld [vmem:[#allocation4 + $0x18] sm:$0xff] }
0x197b   :  { %v837_v50 = vpack.c.bf16 %v831_v49, %v830_v48 }
0x197d   :  { %1109 = vmatmul.mubr.msk.bf16.vlgmr.msra.gmra.mrb[16].mxu0 %vm32_vm2, %v837_v50 }
0x197e   :  { %v833_v52 = vld [vmem:[#allocation4 + $0x28] sm:$0xff] }
0x197f   :  { %v838_v53 = vpack.c.bf16 %v833_v52, %v832_v51 }
0x1981   :  { %1112 = vmatprep.mubr.msk.bf16.mxu0 %vm32_vm2, %v838_v53 }
0x19df   :  { %v824_v54 = vpop.permute.xlu1 %823 }
0x19e0   :  { %826 = vst.msk [vmem:[#allocation4 + $0x38] sm:$0xff] %vm32_vm2, %v824_v54  ;;  %827 = vst.msk [vmem:[#allocation2] sm:$0xff] %vm32_vm2, %v824_v54 }
0x19e7   :  { %v835_v56 = vld [vmem:[#allocation4 + $0x38] sm:$0xff] }
0x19e8   :  { %v839_v57 = vpack.c.bf16 %v835_v56, %v834_v55 }
0x19ea   :  { %1113 = vmatmul.mubr.msk.bf16.gmra.mrb[20].mxu0 %vm32_vm2, %v839_v57 }
0x1a50   :  { %v1110_v60 = vpop.f32.mrb[16].mxu0 }
0x1a51   :  { %v918_v61 = vadd.f32 %v1110_v60, %v988_v59  ;;  %v909_v62 = vpop.f32.mrb[17].mxu0 }
0x1a52   :  { %v910_v63 = vadd.f32 %v988_v59, %v909_v62  ;;  %v1111_v0 = vpop.f32.mrb[18].mxu0 }
0x1a53   :  { %942 = vst.msk [vmem:[#allocation5 + $0x10] sm:$0xff] %vm32_vm2, %v918_v61  ;;  %v921_v1 = vadd.f32 %v1111_v0, %v988_v59  ;;  %v912_v2 = vpop.f32.mrb[19].mxu0 }
0x1a54   :  { %940 = vst.msk [vmem:[#allocation5] sm:$0xff] %vm32_vm2, %v910_v63  ;;  %v913_v3 = vadd.f32 %v988_v59, %v912_v2 }
0x1a55   :  { %943 = vst.msk [vmem:[#allocation5 + $0x18] sm:$0xff] %vm32_vm2, %v921_v1 }
0x1a56   :  { %941 = vst.msk [vmem:[#allocation5 + $0x8] sm:$0xff] %vm32_vm2, %v913_v3 }
0x1abd   :  { %v1114_v5 = vpop.f32.mrb[20].mxu0 }
0x1abe   :  { %v934_v6 = vadd.f32 %v1114_v5, %v988_v59  ;;  %v925_v7 = vpop.f32.mrb[21].mxu0 }
0x1abf   :  { %v926_v8 = vadd.f32 %v988_v59, %v925_v7  ;;  %v1115_v9 = vpop.f32.mrb[22].mxu0 }
0x1ac0   :  { %946 = vst.msk [vmem:[#allocation5 + $0x30] sm:$0xff] %vm32_vm2, %v934_v6  ;;  %v937_v10 = vadd.f32 %v1115_v9, %v988_v59  ;;  %v928_v11 = vpop.f32.mrb[23].mxu0 }
0x1ac1   :  { %944 = vst.msk [vmem:[#allocation5 + $0x20] sm:$0xff] %vm32_vm2, %v926_v8  ;;  %v929_v12 = vadd.f32 %v988_v59, %v928_v11 }
0x1ac2   :  { %947 = vst.msk [vmem:[#allocation5 + $0x38] sm:$0xff] %vm32_vm2, %v937_v10 }
0x1ac3   :  { %945 = vst.msk [vmem:[#allocation5 + $0x28] sm:$0xff] %vm32_vm2, %v929_v12 }
0x1ac4   :  { %1191 = shalt.err (!%p1188_p4)
}
0x1ac5   :  { %s1192_s10 = scalar_lea.hbm %s1513_s7, 1024 }
0x1ac6   :  { %p1193_p5 = scmp.ne.s32.totalorder %s1513_s7, %s1192_s10  ;;  %p1196_p6 = scmp.lt.u32.totalorder %s1192_s10, %s1513_s7 }
0x1ac8   :  { %p1198_p7 = pnand %p1196_p6, %p1193_p5 }
0x1aca   :  { %1201 = shalt.err (!%p1198_p7)
}
0x1acb   :  { %s1210_s15 = smov 128   ;;  %s1211_s16 = smov 8  }
0x1acc   :  { %959 = dma.vmem_to_hbm [thread:$0]  %s954_s8, 1024, %s1513_s7, [#allocation6], %s1210_s15, %s1210_s15, %s1211_s16  }
0x1acd   :  { %1202 = dma.done.wait [#allocation6], 1024  }
0x1ace   :  { %1203 = vsyncadd [#allocation6], 4294966272 }
0x1acf   :  { %963 = vsyncpa [#allocation6], 1 }

</bundles_post_ra>
